<compile_context>
chip_gen: v7x
topology: tpu7x:2x2x1
jax: 0.10.0
libtpu: 0.0.40
codegen_flags: <defaults>
</compile_context>

<pallas_src>
import jax
import jax.numpy as jnp
from jax.experimental import pallas as pl
from jax.experimental.pallas import tpu as pltpu


def _round_up(x, m):
    return ((x + m - 1) // m) * m


# ---------------------------------------------------------------------------
# Kernels
# ---------------------------------------------------------------------------

def ssl_evaluator_kernel_fullk(x_ref, w1_ref, shift_ref, w2_ref, b2_ref, o_ref):
    # x_ref:     (TB, K_pad)        native dtype (f32) input tile
    # w1_ref:    (K_pad, H_pad)     bf16  Linear-1 weight (BN scale folded, resident)
    # shift_ref: (1, H_pad)         f32   fused BN shift = beta - mean * scale
    # w2_ref:    (H_pad, C_pad)     bf16  Linear-2 weight (resident)
    # b2_ref:    (1, C_pad)         f32   Linear-2 bias (resident)
    # o_ref:     (TB, C_pad)        f32   logits tile
    x = x_ref[...].astype(w1_ref.dtype)            # bf16 cast in-kernel (no HBM pass)
    h = jnp.dot(x, w1_ref[...], preferred_element_type=jnp.float32)
    h = jnp.maximum(h + shift_ref[...], 0.0)       # BatchNorm1d (eval) shift + ReLU, f32
    logits = jnp.dot(h.astype(w2_ref.dtype), w2_ref[...],
                     preferred_element_type=jnp.float32) + b2_ref[...]
    o_ref[...] = logits.astype(o_ref.dtype)


def ssl_evaluator_kernel_ktiled(x_ref, w1_ref, shift_ref, w2_ref, b2_ref, o_ref,
                                acc_ref):
    # Fallback for very large n_input: K-tiled reduction with f32 VMEM accumulator.
    k = pl.program_id(1)

    @pl.when(k == 0)
    def _():
        acc_ref[...] = jnp.zeros_like(acc_ref)

    acc_ref[...] += jnp.dot(x_ref[...].astype(w1_ref.dtype), w1_ref[...],
                            preferred_element_type=jnp.float32)

    @pl.when(k == pl.num_programs(1) - 1)
    def _():
        h = jnp.maximum(acc_ref[...] + shift_ref[...], 0.0)
        logits = jnp.dot(h.astype(w2_ref.dtype), w2_ref[...],
                         preferred_element_type=jnp.float32) + b2_ref[...]
        o_ref[...] = logits.astype(o_ref.dtype)


# ---------------------------------------------------------------------------
# One-time parameter prep (BN fold, 128-lane padding, bf16 cast of MXU operands)
# ---------------------------------------------------------------------------

def prepare_ssl_evaluator_params(w1, gamma, beta, running_mean, running_var, w2, b2,
                                 eps=1e-5, compute_dtype=jnp.bfloat16):
    """Do NOT run per forward call.
      * fold eval-mode BatchNorm scale (gamma / sqrt(var + eps)) into w1,
      * zero-pad n_hidden / n_classes to 128 lanes (padded lanes cannot leak:
        padded w1 cols and shift are 0 -> ReLU(0)=0; padded w2 rows/cols are 0),
      * zero-pad n_input (K) to a multiple of 128 (zeroed w1 rows also make any
        zero-padded x tail contribute nothing),
      * cast MXU operands (w1, w2) to bf16; BN/ReLU math stays f32 in-kernel.
    """
    n_input, n_hidden = w1.shape
    n_classes = w2.shape[1]

    scale = gamma / jnp.sqrt(running_var + eps)
    shift = beta - running_mean * scale
    w1_fused = w1 * scale[None, :]                 # BN scale folded into Linear-1

    h_pad = _round_up(n_hidden, 128)               # 128 lanes is enough on all gens
    c_pad = _round_up(n_classes, 128)
    k_pad = _round_up(n_input, 128)

    w1_p = jnp.zeros((k_pad, h_pad), jnp.float32).at[:n_input, :n_hidden].set(w1_fused)
    w2_p = jnp.zeros((h_pad, c_pad), jnp.float32).at[:n_hidden, :n_classes].set(w2)
    shift_p = jnp.zeros((1, h_pad), jnp.float32).at[0, :n_hidden].set(shift)
    b2_p = jnp.zeros((1, c_pad), jnp.float32).at[0, :n_classes].set(b2)

    return dict(
        w1=w1_p.astype(compute_dtype),
        shift=shift_p,
        w2=w2_p.astype(compute_dtype),
        b2=b2_p,
        n_input=n_input,
        n_classes=n_classes,
        k_pad=k_pad,
        h_pad=h_pad,
        c_pad=c_pad,
        compute_dtype=compute_dtype,
    )


# ---------------------------------------------------------------------------
# Forward wrapper
# ---------------------------------------------------------------------------

_VMEM_LIMIT = 32 * 1024 * 1024    # explicit: v5e scoped default is only 16 MiB
_VMEM_BUDGET = 24 * 1024 * 1024   # headroom under the limit (and under v7x 64 MiB/TC)


def _fullk_vmem_bytes(tb, k_pad, h_pad, c_pad, x_bytes, w_bytes):
    return (2 * tb * k_pad * x_bytes          # x tile, double-buffered
            + 2 * k_pad * h_pad * w_bytes     # w1 (conservatively double-buffered)
            + 2 * tb * c_pad * 4              # out tile, double-buffered
            + h_pad * c_pad * w_bytes + 4 * (h_pad + c_pad))


def _ktiled_vmem_bytes(tb, tk, h_pad, c_pad, x_bytes, w_bytes):
    return (2 * tb * tk * x_bytes + 2 * tk * h_pad * w_bytes
            + tb * h_pad * 4 + 2 * tb * c_pad * 4
            + h_pad * c_pad * w_bytes + 4 * (h_pad + c_pad))


def ssl_evaluator_forward(x_nchw, params, tb=512):
    """x_nchw: (N, C, H, W). Returns logits (N, n_classes) float32."""
    n = x_nchw.shape[0]
    x_flat = x_nchw.reshape(n, -1)                 # Flatten: view(N, -1)
    k = x_flat.shape[1]
    assert k == params["n_input"]

    h_pad, c_pad, k_pad = params["h_pad"], params["c_pad"], params["k_pad"]
    n_classes = params["n_classes"]
    x_bytes = x_flat.dtype.itemsize
    w_bytes = jnp.dtype(params["compute_dtype"]).itemsize

    # Batch tile: multiple of 16 sublanes, and >= 2 tiles when the batch allows
    # it so v7x's two TensorCores both get a share of the "parallel" axis.
    n_pad_min = _round_up(n, 16)
    tb = min(tb, n_pad_min)
    if n_pad_min // tb < 2 and n_pad_min >= 32:
        tb = _round_up(n_pad_min // 2, 16)
    # Shrink tb if the whole-K x tile would blow the VMEM budget.
    while tb > 16 and _fullk_vmem_bytes(tb, k_pad, h_pad, c_pad,
                                        x_bytes, w_bytes) > _VMEM_BUDGET:
        tb = max(16, _round_up(tb // 2, 16))
    n_pad = _round_up(n, tb)

    # Pad only when actually needed; keep x in its native dtype (bf16 cast
    # happens inside the kernel, so x never takes an extra HBM cast pass).
    if (n_pad != n) or (k_pad != k):
        x_p = jnp.pad(x_flat, ((0, n_pad - n), (0, k_pad - k)))
    else:
        x_p = x_flat

    args = (x_p, params["w1"], params["shift"], params["w2"], params["b2"])
    out_shape = jax.ShapeDtypeStruct((n_pad, c_pad), jnp.float32)

    if _fullk_vmem_bytes(tb, k_pad, h_pad, c_pad, x_bytes, w_bytes) <= _VMEM_BUDGET:
        # Preferred path: no K grid axis, resident w1, no accumulator/epilogue.
        out = pl.pallas_call(
            ssl_evaluator_kernel_fullk,
            out_shape=out_shape,
            grid_spec=pltpu.PrefetchScalarGridSpec(
                num_scalar_prefetch=0,
                grid=(n_pad // tb,),
                in_specs=[
                    pl.BlockSpec((tb, k_pad), lambda i: (i, 0)),        # x: batch tiled
                    pl.BlockSpec((k_pad, h_pad), lambda i: (0, 0)),     # w1: resident
                    pl.BlockSpec((1, h_pad), lambda i: (0, 0)),         # BN shift
                    pl.BlockSpec((h_pad, c_pad), lambda i: (0, 0)),     # w2: resident
                    pl.BlockSpec((1, c_pad), lambda i: (0, 0)),         # b2: resident
                ],
                out_specs=pl.BlockSpec((tb, c_pad), lambda i: (i, 0)),
            ),
            compiler_params=pltpu.CompilerParams(
                dimension_semantics=("parallel",),
                vmem_limit_bytes=_VMEM_LIMIT,
            ),
        )(*args)
    else:
        # Fallback (very large n_input): K-tiled reduction with f32 accumulator.
        tk = 128
        for cand in (2048, 1024, 512, 256, 128):
            if k_pad % cand == 0 and _ktiled_vmem_bytes(
                    tb, cand, h_pad, c_pad, x_bytes, w_bytes) <= _VMEM_BUDGET:
                tk = cand
                break
        out = pl.pallas_call(
            ssl_evaluator_kernel_ktiled,
            out_shape=out_shape,
            grid_spec=pltpu.PrefetchScalarGridSpec(
                num_scalar_prefetch=0,
                grid=(n_pad // tb, k_pad // tk),
                in_specs=[
                    pl.BlockSpec((tb, tk), lambda i, kk: (i, kk)),       # x: batch+K tiled
                    pl.BlockSpec((tk, h_pad), lambda i, kk: (kk, 0)),    # w1: K tiled
                    pl.BlockSpec((1, h_pad), lambda i, kk: (0, 0)),
                    pl.BlockSpec((h_pad, c_pad), lambda i, kk: (0, 0)),
                    pl.BlockSpec((1, c_pad), lambda i, kk: (0, 0)),
                ],
                out_specs=pl.BlockSpec((tb, c_pad), lambda i, kk: (i, 0)),
                scratch_shapes=[pltpu.VMEM((tb, h_pad), jnp.float32)],
            ),
            compiler_params=pltpu.CompilerParams(
                dimension_semantics=("parallel", "arbitrary"),
                vmem_limit_bytes=_VMEM_LIMIT,
            ),
        )(*args)

    # TODO(synk): consumers that accept padded logits can take `out` directly
    # (keeps 128-lane stores and skips this slice copy).
    return out[:n, :n_classes]


# ---------------------------------------------------------------------------
# Reference + test
# ---------------------------------------------------------------------------

def _reference_forward(x_nchw, w1, gamma, beta, mean, var, w2, b2, eps=1e-5,
                       compute_dtype=jnp.float32):
    x = x_nchw.reshape(x_nchw.shape[0], -1)
    scale = gamma / jnp.sqrt(var + eps)
    shift = beta - mean * scale
    w1f = (w1 * scale[None, :]).astype(compute_dtype)
    h = jnp.dot(x.astype(compute_dtype), w1f,
                preferred_element_type=jnp.float32) + shift
    h = jnp.maximum(h, 0.0)
    return jnp.dot(h.astype(compute_dtype), w2.astype(compute_dtype),
                   preferred_element_type=jnp.float32) + b2


if __name__ == "__main__":
    # Small shapes consistent with the module: NCHW input, flatten -> MLP head.
    batch, C, H, W = 2, 4, 16, 16
    n_input = C * H * W          # 1024
    n_hidden = 32
    n_classes = 10

    key = jax.random.PRNGKey(0)
    k_x, k_w1, k_w2, k_b2, k_g, k_b, k_m, k_v = jax.random.split(key, 8)

    x = jax.random.normal(k_x, (batch, C, H, W), dtype=jnp.float32)

    # Deterministic parameter init (shapes from SSLEvaluator.__init__).
    w1 = jax.random.normal(k_w1, (n_input, n_hidden), dtype=jnp.float32) * 0.02
    w2 = jax.random.normal(k_w2, (n_hidden, n_classes), dtype=jnp.float32) * 0.1
    b2 = jax.random.normal(k_b2, (n_classes,), dtype=jnp.float32) * 0.1
    gamma = 1.0 + 0.1 * jax.random.normal(k_g, (n_hidden,), dtype=jnp.float32)
    beta = 0.1 * jax.random.normal(k_b, (n_hidden,), dtype=jnp.float32)
    running_mean = 0.1 * jax.random.normal(k_m, (n_hidden,), dtype=jnp.float32)
    running_var = jnp.abs(1.0 + 0.1 * jax.random.normal(k_v, (n_hidden,), dtype=jnp.float32))

    # One-time weight transform (BN fold, 128-lane padding, bf16 cast).
    params = prepare_ssl_evaluator_params(
        w1, gamma, beta, running_mean, running_var, w2, b2)

    logits = ssl_evaluator_forward(x, params)
    logits = jax.block_until_ready(logits)
    assert logits.shape == (batch, n_classes)

    # Compare against a reference using the same bf16 MXU-operand casts (tight),
    # and a pure-f32 reference (loose, guards semantics).
    ref_bf16 = _reference_forward(x, w1, gamma, beta, running_mean, running_var,
                                  w2, b2, compute_dtype=jnp.bfloat16)
    ref_f32 = _reference_forward(x, w1, gamma, beta, running_mean, running_var,
                                 w2, b2, compute_dtype=jnp.float32)
    err_bf16 = float(jnp.max(jnp.abs(logits - ref_bf16)))
    err_f32 = float(jnp.max(jnp.abs(logits - ref_f32)))
    assert jnp.allclose(logits, ref_bf16, atol=2e-2, rtol=2e-2), f"bf16-ref err {err_bf16}"
    assert jnp.allclose(logits, ref_f32, atol=1e-1, rtol=1e-1), f"f32-ref err {err_f32}"

    print("KERNEL_OK")
</pallas_src>

<mosaic_0001>
module attributes {stable_mosaic.version = 11 : i64} {
  func.func @ssl_evaluator_kernel_fullk(%arg0: i32, %arg1: memref<16x1024xf32, #tpu.memory_space<vmem>>, %arg2: memref<1024x128xbf16, #tpu.memory_space<vmem>>, %arg3: memref<1x128xf32, #tpu.memory_space<vmem>>, %arg4: memref<128x128xbf16, #tpu.memory_space<vmem>>, %arg5: memref<1x128xf32, #tpu.memory_space<vmem>>, %arg6: memref<16x128xf32, #tpu.memory_space<vmem>>) attributes {dimension_semantics = [#tpu.dimension_semantics<parallel>], iteration_bounds = array<i64: 1>, scalar_prefetch = 0 : i64, scratch_operands = 0 : i64, tpu.core_type = #tpu.core_type<tc>, window_params = [{transform_indices = @transform_0, window_bounds = array<i64: 16, 1024>}, {pipeline_mode = #tpu.pipeline_mode<synchronous>, transform_indices = @transform_1, window_bounds = array<i64: 1024, 128>}, {pipeline_mode = #tpu.pipeline_mode<synchronous>, transform_indices = @transform_2, window_bounds = array<i64: 1, 128>}, {pipeline_mode = #tpu.pipeline_mode<synchronous>, transform_indices = @transform_3, window_bounds = array<i64: 128, 128>}, {pipeline_mode = #tpu.pipeline_mode<synchronous>, transform_indices = @transform_4, window_bounds = array<i64: 1, 128>}, {transform_indices = @transform_5, window_bounds = array<i64: 16, 128>}]} {
    %c0 = arith.constant 0 : index
    %c0_0 = arith.constant 0 : index
    %0 = vector.load %arg1[%c0, %c0_0] : memref<16x1024xf32, #tpu.memory_space<vmem>>, vector<16x1024xf32>
    %1 = arith.truncf %0 : vector<16x1024xf32> to vector<16x1024xbf16>
    %c0_1 = arith.constant 0 : index
    %c0_2 = arith.constant 0 : index
    %2 = vector.load %arg2[%c0_1, %c0_2] : memref<1024x128xbf16, #tpu.memory_space<vmem>>, vector<1024x128xbf16>
    %cst = arith.constant dense<0.000000e+00> : vector<16x128xf32>
    %3 = tpu.matmul %1, %2, %cst {dimension_numbers = #tpu.dot_dimension_numbers<[1], [0], [0], [1], [0, 0, 1, 1], [], []>} : vector<16x1024xbf16>, vector<1024x128xbf16>, vector<16x128xf32> -> vector<16x128xf32>
    %c0_3 = arith.constant 0 : index
    %c0_4 = arith.constant 0 : index
    %4 = vector.load %arg3[%c0_3, %c0_4] : memref<1x128xf32, #tpu.memory_space<vmem>>, vector<1x128xf32>
    %5 = vector.broadcast %4 : vector<1x128xf32> to vector<16x128xf32>
    %6 = arith.addf %3, %5 : vector<16x128xf32>
    %cst_5 = arith.constant 0.000000e+00 : f32
    %7 = vector.broadcast %cst_5 : f32 to vector<16x128xf32>
    %8 = arith.maximumf %6, %7 : vector<16x128xf32>
    %9 = arith.truncf %8 : vector<16x128xf32> to vector<16x128xbf16>
    %c0_6 = arith.constant 0 : index
    %c0_7 = arith.constant 0 : index
    %10 = vector.load %arg4[%c0_6, %c0_7] : memref<128x128xbf16, #tpu.memory_space<vmem>>, vector<128x128xbf16>
    %cst_8 = arith.constant dense<0.000000e+00> : vector<16x128xf32>
    %11 = tpu.matmul %9, %10, %cst_8 {dimension_numbers = #tpu.dot_dimension_numbers<[1], [0], [0], [1], [0, 0, 1, 1], [], []>} : vector<16x128xbf16>, vector<128x128xbf16>, vector<16x128xf32> -> vector<16x128xf32>
    %c0_9 = arith.constant 0 : index
    %c0_10 = arith.constant 0 : index
    %12 = vector.load %arg5[%c0_9, %c0_10] : memref<1x128xf32, #tpu.memory_space<vmem>>, vector<1x128xf32>
    %13 = vector.broadcast %12 : vector<1x128xf32> to vector<16x128xf32>
    %14 = arith.addf %11, %13 : vector<16x128xf32>
    %c0_11 = arith.constant 0 : index
    %c0_12 = arith.constant 0 : index
    %15 = vector.load %arg6[%c0_11, %c0_12] : memref<16x128xf32, #tpu.memory_space<vmem>>, vector<16x128xf32>
    tpu.vector_store %arg6[%c0_11, %c0_12], %14 {strides = array<i32>} : memref<16x128xf32, #tpu.memory_space<vmem>>, vector<16x128xf32>,
    return
  }
  func.func @transform_0(%arg0: i32) -> (i32, i32) {
    %c0_i32 = arith.constant 0 : i32
    %c0_i32_0 = arith.constant 0 : i32
    return %arg0, %c0_i32 : i32, i32
  }
  func.func @transform_1(%arg0: i32) -> (i32, i32) {
    %c0_i32 = arith.constant 0 : i32
    %c0_i32_0 = arith.constant 0 : i32
    %c0_i32_1 = arith.constant 0 : i32
    return %c0_i32, %c0_i32_0 : i32, i32
  }
  func.func @transform_2(%arg0: i32) -> (i32, i32) {
    %c0_i32 = arith.constant 0 : i32
    %c0_i32_0 = arith.constant 0 : i32
    %c0_i32_1 = arith.constant 0 : i32
    return %c0_i32, %c0_i32_0 : i32, i32
  }
  func.func @transform_3(%arg0: i32) -> (i32, i32) {
    %c0_i32 = arith.constant 0 : i32
    %c0_i32_0 = arith.constant 0 : i32
    %c0_i32_1 = arith.constant 0 : i32
    return %c0_i32, %c0_i32_0 : i32, i32
  }
  func.func @transform_4(%arg0: i32) -> (i32, i32) {
    %c0_i32 = arith.constant 0 : i32
    %c0_i32_0 = arith.constant 0 : i32
    %c0_i32_1 = arith.constant 0 : i32
    return %c0_i32, %c0_i32_0 : i32, i32
  }
  func.func @transform_5(%arg0: i32) -> (i32, i32) {
    %c0_i32 = arith.constant 0 : i32
    %c0_i32_0 = arith.constant 0 : i32
    return %arg0, %c0_i32 : i32, i32
  }
}

</mosaic_0001>

<bundles_post_ra>
// kernel: tpu_custom_call.1
= control target key start
LH: loop header
LB: loop body
LE: loop exit
PB: predicated region body
PF: predicated region fallthrough
CT: control target
= control target key end

     0   :  { %10 = vsyncpa [#allocation3], 0  ;;  %s1375_s0 = inlined_call_operand.hbm [shape: f32[16,1024], index: 0, kind: input, shape index: {}]   ;;  %s1376_s1 = inlined_call_operand.hbm [shape: bf16[1024,128], index: 1, kind: input, shape index: {}]   ;;  %s1377_s2 = inlined_call_operand.vmem [shape: f32[1,128], index: 2, kind: input, shape index: {}]   ;;  %s1378_s3 = inlined_call_operand.hbm [shape: bf16[128,128], index: 3, kind: input, shape index: {}]   ;;  %s1379_s4 = inlined_call_operand.vmem [shape: f32[1,128], index: 4, kind: input, shape index: {}]   ;;  %s1380_s5 = inlined_call_operand.hbm [shape: f32[16,128], index: 5, kind: output, shape index: {}]  }
   0x1   :  { %11 = vsyncpa [#allocation6], 0 }
   0x2   :  { %12 = vsyncpa [#allocation4], 0  ;;  %s1273_s18 = smov [#allocation5]   ;;  %s1179_s22 = scalar_lea.hbm %s1376_s1, 8192 }
   0x3   :  { %s30_s19 = sshll.u32 %s1273_s18, 4  ;;  %p1180_p0 = scmp.ne.s32.totalorder %s1376_s1, %s1179_s22  ;;  %s31_s19 = int_to_ptr.vmem [resolvable:$true] %s30_s19 }
   0x4   :  { %p1183_p1 = scmp.lt.u32.totalorder %s1179_s22, %s1376_s1 }
   0x6   :  { %p1185_p2 = pnand %p1183_p1, %p1180_p0 }
   0x8   :  { %1188 = shalt.err (!%p1185_p2)
}
   0x9   :  { %s1189_s27 = scalar_lea.vmem %s31_s19, 8192  ;;  %p1194_p4 = scmp.lt.s32.totalorder %s31_s19, %s31_s19 }
   0xa   :  { %p1190_p3 = scmp.ne.s32.totalorder %s31_s19, %s1189_s27  ;;  %p1195_p5 = scmp.lt.s32.totalorder %s1189_s27, %s1189_s27 }
   0xc   :  { %p1196_p6 = por %p1195_p5, %p1194_p4 }
   0xe   :  { %p1197_p7 = pnand %p1196_p6, %p1190_p3 }
  0x10   :  { %1200 = shalt.err (!%p1197_p7)
}
  0x11   :  { %s1274_s28 = smov 64   ;;  %s1275_s29 = smov 4  }
  0x12   :  { %36 = dma.hbm_to_vmem [thread:$0]  %s1376_s1, 8192, %s31_s19, [#allocation6], %s1274_s28, %s1274_s28, %s1275_s29  }
  0x13   :  { %s1276_s7 = smov [#allocation2]   ;;  %s1201_s11 = scalar_lea.hbm %s1375_s0, 2048 }
  0x14   :  { %s18_s8 = sshll.u32 %s1276_s7, 4  ;;  %p1202_p8 = scmp.ne.s32.totalorder %s1375_s0, %s1201_s11  ;;  %s19_s8 = int_to_ptr.vmem [resolvable:$true] %s18_s8 }
  0x15   :  { %p1205_p9 = scmp.lt.u32.totalorder %s1201_s11, %s1375_s0 }
  0x17   :  { %p1207_p10 = pnand %p1205_p9, %p1202_p8 }
  0x19   :  { %1210 = shalt.err (!%p1207_p10)
}
  0x1a   :  { %s1211_s16 = scalar_lea.vmem %s19_s8, 2048  ;;  %p1216_p12 = scmp.lt.s32.totalorder %s19_s8, %s19_s8 }
  0x1b   :  { %p1212_p11 = scmp.ne.s32.totalorder %s19_s8, %s1211_s16  ;;  %p1217_p13 = scmp.lt.s32.totalorder %s1211_s16, %s1211_s16 }
  0x1d   :  { %p1218_p0 = por %p1217_p13, %p1216_p12 }
  0x1f   :  { %p1219_p1 = pnand %p1218_p0, %p1212_p11 }
  0x21   :  { %1222 = shalt.err (!%p1219_p1)
}
  0x22   :  { %s1277_s1 = smov 1024   ;;  %s1278_s19 = smov [#allocation7]  }
  0x23   :  { %24 = dma.hbm_to_vmem [thread:$0]  %s1375_s0, 2048, %s19_s8, [#allocation3], %s1277_s1, %s1277_s1, %s1274_s28  }
  0x24   :  { %s44_s20 = sshll.u32 %s1278_s19, 4  ;;  %s1223_s23 = scalar_lea.hbm %s1378_s3, 1024  ;;  %s45_s20 = int_to_ptr.vmem [resolvable:$true] %s44_s20 }
  0x25   :  { %p1224_p2 = scmp.ne.s32.totalorder %s1378_s3, %s1223_s23  ;;  %p1227_p3 = scmp.lt.u32.totalorder %s1223_s23, %s1378_s3 }
  0x27   :  { %p1229_p4 = pnand %p1227_p3, %p1224_p2 }
  0x29   :  { %1232 = shalt.err (!%p1229_p4)
}
  0x2a   :  { %s1233_s30 = scalar_lea.vmem %s45_s20, 1024  ;;  %p1238_p6 = scmp.lt.s32.totalorder %s45_s20, %s45_s20 }
  0x2b   :  { %p1234_p5 = scmp.ne.s32.totalorder %s45_s20, %s1233_s30  ;;  %p1239_p7 = scmp.lt.s32.totalorder %s1233_s30, %s1233_s30 }
  0x2d   :  { %p1240_p8 = por %p1239_p7, %p1238_p6 }
  0x2f   :  { %p1241_p9 = pnand %p1240_p8, %p1234_p5 }
  0x31   :  { %1244 = shalt.err (!%p1241_p9)
}
  0x32   :  { %50 = dma.hbm_to_vmem [thread:$0]  %s1378_s3, 1024, %s45_s20, [#allocation6], %s1274_s28, %s1274_s28, %s1275_s29  }
  0x33   :  { %1267 = dma.done.wait [#allocation3], 2048  }
  0x34   :  { %1268 = vsyncadd [#allocation3], 4294965248 }
  0x35   :  { %1269 = dma.done.wait [#allocation6], 9216  }
  0x36   :  { %1270 = vsyncadd [#allocation6], 4294958080  ;;  %v1107_v0 = vld [vmem:[#allocation5 + $0x40] sm:$0xff]   ;;  %v1111_v4 = vld [vmem:[#allocation5 + $0x48] sm:$0xff]   ;;  %vm1280_vm0 = vmmov 0   ;;  %s1281_s7 = smov [#allocation8]  }
  0x37   :  { %v1108_v1 = vld [vmem:[#allocation5 + $0xc0] sm:$0xff]   ;;  %979 = vmatprep.subr.bf16.mxu0 %v1107_v0  ;;  %v1112_v5 = vld [vmem:[#allocation5 + $0xc8] sm:$0xff]   ;;  %v1115_v8 = vld [vmem:[#allocation5 + $0x50] sm:$0xff]   ;;  %s892_s8 = sshll.u32 %s1281_s7, 4  ;;  %s893_s8 = int_to_ptr.vmem [resolvable:$true] %s892_s8 }
  0x38   :  { %v1109_v2 = vld [vmem:[#allocation5] sm:$0xff]   ;;  %1001 = vmatprep.subr.bf16.mxu1 %v1108_v1  ;;  %v1113_v6 = vld [vmem:[#allocation5 + $0x8] sm:$0xff]   ;;  %v1116_v9 = vld [vmem:[#allocation5 + $0xd0] sm:$0xff]   ;;  %s1245_s9 = scalar_lea.vmem %s893_s8, 256  ;;  %p1250_p11 = scmp.lt.s32.totalorder %s893_s8, %s893_s8 }
  0x39   :  { %v1110_v3 = vld [vmem:[#allocation5 + $0x80] sm:$0xff]   ;;  %980 = vmatpush3.bf16.msra.mxu0 %v1109_v2  ;;  %v1114_v7 = vld [vmem:[#allocation5 + $0x88] sm:$0xff]   ;;  %v1117_v10 = vld [vmem:[#allocation5 + $0x10] sm:$0xff]   ;;  %p1246_p10 = scmp.ne.s32.totalorder %s893_s8, %s1245_s9  ;;  %p1251_p12 = scmp.lt.s32.totalorder %s1245_s9, %s1245_s9 }
  0x3a   :  { %1002 = vmatpush3.bf16.msra.mxu1 %v1110_v3  ;;  %981 = vmatprep.subr.bf16.mxu0 %v1111_v4  ;;  %v1118_v11 = vld [vmem:[#allocation5 + $0x90] sm:$0xff]   ;;  %v1119_v12 = vld [vmem:[#allocation5 + $0x58] sm:$0xff]   ;;  %v1123_v16 = vld [vmem:[#allocation5 + $0x60] sm:$0xff]  }
  0x3b   :  { %1003 = vmatprep.subr.bf16.mxu1 %v1112_v5  ;;  %v1120_v13 = vld [vmem:[#allocation5 + $0xd8] sm:$0xff]   ;;  %v1124_v17 = vld [vmem:[#allocation5 + $0xe0] sm:$0xff]   ;;  %v1127_v20 = vld [vmem:[#allocation5 + $0x68] sm:$0xff]   ;;  %p1252_p13 = por %p1251_p12, %p1250_p11 }
  0x3c   :  { %v1121_v14 = vld [vmem:[#allocation5 + $0x18] sm:$0xff]   ;;  %v1125_v18 = vld [vmem:[#allocation5 + $0x20] sm:$0xff]   ;;  %v1128_v21 = vld [vmem:[#allocation5 + $0xe8] sm:$0xff]  }
  0x3d   :  { %982 = vmatpush3.bf16.msra.mxu0 %v1113_v6  ;;  %v1122_v15 = vld [vmem:[#allocation5 + $0x98] sm:$0xff]   ;;  %v1126_v19 = vld [vmem:[#allocation5 + $0xa0] sm:$0xff]   ;;  %v1129_v22 = vld [vmem:[#allocation5 + $0x28] sm:$0xff]   ;;  %p1253_p0 = pnand %p1252_p13, %p1246_p10 }
  0x3e   :  { %1004 = vmatpush3.bf16.msra.mxu1 %v1114_v7  ;;  %983 = vmatprep.subr.bf16.mxu0 %v1115_v8  ;;  %v1130_v23 = vld [vmem:[#allocation5 + $0xa8] sm:$0xff]   ;;  %v1131_v24 = vld [vmem:[#allocation5 + $0x70] sm:$0xff]   ;;  %v1135_v28 = vld [vmem:[#allocation5 + $0x78] sm:$0xff]  }
  0x3f   :  { %1005 = vmatprep.subr.bf16.mxu1 %v1116_v9  ;;  %v1132_v25 = vld [vmem:[#allocation5 + $0xf0] sm:$0xff]   ;;  %v1136_v29 = vld [vmem:[#allocation5 + $0xf8] sm:$0xff]   ;;  %v64_v32 = vld [vmem:[#allocation2 + $0x8] sm:$0xff] }
  0x40   :  { %v1133_v26 = vld [vmem:[#allocation5 + $0x30] sm:$0xff]   ;;  %v1137_v30 = vld [vmem:[#allocation5 + $0x38] sm:$0xff]   ;;  %v72_v33 = vld [vmem:[#allocation2 + $0x48] sm:$0xff] }
  0x41   :  { %984 = vmatpush3.bf16.msra.mxu0 %v1117_v10  ;;  %v1134_v27 = vld [vmem:[#allocation5 + $0xb0] sm:$0xff]   ;;  %v1138_v31 = vld [vmem:[#allocation5 + $0xb8] sm:$0xff]   ;;  %v80_v35 = vpack.c.bf16 %v72_v33, %v64_v32  ;;  %v63_v37 = vld [vmem:[#allocation2] sm:$0xff] }
  0x42   :  { %1006 = vmatpush3.bf16.msra.mxu1 %v1118_v11  ;;  %985 = vmatprep.subr.bf16.mxu0 %v1119_v12  ;;  %v66_v34 = vld [vmem:[#allocation2 + $0x18] sm:$0xff]  ;;  %v71_v38 = vld [vmem:[#allocation2 + $0x40] sm:$0xff]  ;;  %v65_v41 = vld [vmem:[#allocation2 + $0x10] sm:$0xff] }
  0x43   :  { %1007 = vmatprep.subr.bf16.mxu1 %v1120_v13  ;;  %v74_v36 = vld [vmem:[#allocation2 + $0x58] sm:$0xff]  ;;  %v79_v40 = vpack.c.bf16 %v71_v38, %v63_v37  ;;  %v73_v42 = vld [vmem:[#allocation2 + $0x50] sm:$0xff]  ;;  %638 = vmatprep.mubr.bf16.mxu0 %v80_v35  ;;  %v1139_v44 = vld [vmem:[#allocation5 + $0x140] sm:$0xff]  }
  0x44   :  { %v82_v39 = vpack.c.bf16 %v74_v36, %v66_v34  ;;  %v81_v43 = vpack.c.bf16 %v73_v42, %v65_v41  ;;  %v1140_v45 = vld [vmem:[#allocation5 + $0x1c0] sm:$0xff]   ;;  %v1143_v48 = vld [vmem:[#allocation5 + $0x148] sm:$0xff]   ;;  %v1147_v52 = vld [vmem:[#allocation5 + $0x150] sm:$0xff]  }
  0x45   :  { %986 = vmatpush3.bf16.msra.mxu0 %v1121_v14  ;;  %v1141_v46 = vld [vmem:[#allocation5 + $0x100] sm:$0xff]   ;;  %v1144_v49 = vld [vmem:[#allocation5 + $0x1c8] sm:$0xff]   ;;  %v1148_v53 = vld [vmem:[#allocation5 + $0x1d0] sm:$0xff]  }
  0x46   :  { %1008 = vmatpush3.bf16.msra.mxu1 %v1122_v15  ;;  %987 = vmatprep.subr.bf16.mxu0 %v1123_v16  ;;  %v1142_v47 = vld [vmem:[#allocation5 + $0x180] sm:$0xff]   ;;  %v1145_v50 = vld [vmem:[#allocation5 + $0x108] sm:$0xff]   ;;  %v1149_v54 = vld [vmem:[#allocation5 + $0x110] sm:$0xff]  }
  0x47   :  { %1009 = vmatprep.subr.bf16.mxu1 %v1124_v17  ;;  %679 = vmatprep.mubr.bf16.mxu1 %v82_v39  ;;  %v1146_v51 = vld [vmem:[#allocation5 + $0x188] sm:$0xff]   ;;  %v1150_v55 = vld [vmem:[#allocation5 + $0x190] sm:$0xff]   ;;  %v1151_v56 = vld [vmem:[#allocation5 + $0x158] sm:$0xff]  }
  0x48   :  { %v1152_v57 = vld [vmem:[#allocation5 + $0x1d8] sm:$0xff]   ;;  %v1155_v60 = vld [vmem:[#allocation5 + $0x160] sm:$0xff]   ;;  %v1159_v0 = vld [vmem:[#allocation5 + $0x168] sm:$0xff]  }
  0x49   :  { %988 = vmatpush3.bf16.msra.mxu0 %v1125_v18  ;;  %v1153_v58 = vld [vmem:[#allocation5 + $0x118] sm:$0xff]   ;;  %v1156_v61 = vld [vmem:[#allocation5 + $0x1e0] sm:$0xff]   ;;  %v1160_v1 = vld [vmem:[#allocation5 + $0x1e8] sm:$0xff]  }
  0x4a   :  { %1010 = vmatpush3.bf16.msra.mxu1 %v1126_v19  ;;  %989 = vmatprep.subr.bf16.mxu0 %v1127_v20  ;;  %v1154_v59 = vld [vmem:[#allocation5 + $0x198] sm:$0xff]   ;;  %v1157_v62 = vld [vmem:[#allocation5 + $0x120] sm:$0xff]   ;;  %v1161_v2 = vld [vmem:[#allocation5 + $0x128] sm:$0xff]  }
  0x4b   :  { %1011 = vmatprep.subr.bf16.mxu1 %v1128_v21  ;;  %v1158_v63 = vld [vmem:[#allocation5 + $0x1a0] sm:$0xff]   ;;  %v1162_v3 = vld [vmem:[#allocation5 + $0x1a8] sm:$0xff]   ;;  %v1163_v4 = vld [vmem:[#allocation5 + $0x170] sm:$0xff]  }
  0x4c   :  { %v1164_v5 = vld [vmem:[#allocation5 + $0x1f0] sm:$0xff]   ;;  %v1167_v8 = vld [vmem:[#allocation5 + $0x178] sm:$0xff]   ;;  %v68_v12 = vld [vmem:[#allocation2 + $0x28] sm:$0xff] }
  0x4d   :  { %990 = vmatpush3.bf16.msra.mxu0 %v1129_v22  ;;  %v1165_v6 = vld [vmem:[#allocation5 + $0x130] sm:$0xff]   ;;  %v1168_v9 = vld [vmem:[#allocation5 + $0x1f8] sm:$0xff]   ;;  %v76_v13 = vld [vmem:[#allocation2 + $0x68] sm:$0xff] }
  0x4e   :  { %1012 = vmatpush3.bf16.msra.mxu1 %v1130_v23  ;;  %991 = vmatprep.subr.bf16.mxu0 %v1131_v24  ;;  %v1166_v7 = vld [vmem:[#allocation5 + $0x1b0] sm:$0xff]   ;;  %v1169_v10 = vld [vmem:[#allocation5 + $0x138] sm:$0xff]   ;;  %v84_v16 = vpack.c.bf16 %v76_v13, %v68_v12  ;;  %v67_v18 = vld [vmem:[#allocation2 + $0x20] sm:$0xff] }
  0x4f   :  { %1013 = vmatprep.subr.bf16.mxu1 %v1132_v25  ;;  %v1170_v11 = vld [vmem:[#allocation5 + $0x1b8] sm:$0xff]   ;;  %v75_v19 = vld [vmem:[#allocation2 + $0x60] sm:$0xff]  ;;  %v69_v20 = vld [vmem:[#allocation2 + $0x30] sm:$0xff]  ;;  %v1279_v25 = vmov 0.0  }
  0x50   :  { %v70_v14 = vld [vmem:[#allocation2 + $0x38] sm:$0xff]  ;;  %v83_v21 = vpack.c.bf16 %v75_v19, %v67_v18  ;;  %v77_v22 = vld [vmem:[#allocation2 + $0x70] sm:$0xff]  ;;  %v1171_v24 = vld [vmem:[#allocation7] sm:$0xff]  }
  0x51   :  { %992 = vmatpush3.bf16.msra.mxu0 %v1133_v26  ;;  %v78_v15 = vld [vmem:[#allocation2 + $0x78] sm:$0xff]  ;;  %v85_v23 = vpack.c.bf16 %v77_v22, %v69_v20  ;;  %v1172_v26 = vld [vmem:[#allocation7 + $0x8] sm:$0xff]   ;;  %v905_v35 = vld [vmem:[%s1377_s2] ss:$0 sm:$0xff] }
  0x52   :  { %1014 = vmatpush3.bf16.msra.mxu1 %v1134_v27  ;;  %993 = vmatprep.subr.bf16.mxu0 %v1135_v28  ;;  %v86_v17 = vpack.c.bf16 %v78_v15, %v70_v14  ;;  %v1173_v27 = vld [vmem:[#allocation7 + $0x10] sm:$0xff]   ;;  %v1174_v28 = vld [vmem:[#allocation7 + $0x18] sm:$0xff]  }
  0x53   :  { %1015 = vmatprep.subr.bf16.mxu1 %v1136_v29  ;;  %v1175_v29 = vld [vmem:[#allocation7 + $0x20] sm:$0xff]   ;;  %v1178_v32 = vld [vmem:[#allocation7 + $0x38] sm:$0xff]  }
  0x55   :  { %994 = vmatpush3.bf16.msra.mxu0 %v1137_v30  ;;  %v1176_v30 = vld [vmem:[#allocation7 + $0x28] sm:$0xff]  }
  0x56   :  { %1016 = vmatpush3.bf16.msra.mxu1 %v1138_v31  ;;  %1023 = vmatprep.subr.bf16.mxu0 %v1139_v44  ;;  %v1177_v31 = vld [vmem:[#allocation7 + $0x30] sm:$0xff]  }
  0x57   :  { %1045 = vmatprep.subr.bf16.mxu1 %v1140_v45 }
  0x58   :  { %639 = vmatmul.mubr.bf16.vlgmr.msra.gmra.mrb[0].mxu0 %v79_v40 }
  0x59   :  { %680 = vmatmul.mubr.bf16.vlgmr.msra.gmra.mrb[0].mxu1 %v81_v43  ;;  %1024 = vmatpush3.bf16.msra.mxu0 %v1141_v46 }
  0x5a   :  { %1046 = vmatpush3.bf16.msra.mxu1 %v1142_v47  ;;  %1025 = vmatprep.subr.bf16.mxu0 %v1143_v48 }
  0x5b   :  { %1047 = vmatprep.subr.bf16.mxu1 %v1144_v49  ;;  %720 = vmatprep.mubr.bf16.mxu0 %v84_v16 }
  0x5c   :  { %761 = vmatprep.mubr.bf16.mxu1 %v86_v17 }
  0x5d   :  { %1026 = vmatpush3.bf16.msra.mxu0 %v1145_v50 }
  0x5e   :  { %1048 = vmatpush3.bf16.msra.mxu1 %v1146_v51  ;;  %1027 = vmatprep.subr.bf16.mxu0 %v1147_v52 }
  0x5f   :  { %1049 = vmatprep.subr.bf16.mxu1 %v1148_v53 }
  0x61   :  { %1028 = vmatpush3.bf16.msra.mxu0 %v1149_v54 }
  0x62   :  { %1050 = vmatpush3.bf16.msra.mxu1 %v1150_v55  ;;  %1029 = vmatprep.subr.bf16.mxu0 %v1151_v56 }
  0x63   :  { %1051 = vmatprep.subr.bf16.mxu1 %v1152_v57 }
  0x65   :  { %1030 = vmatpush3.bf16.msra.mxu0 %v1153_v58 }
  0x66   :  { %1052 = vmatpush3.bf16.msra.mxu1 %v1154_v59  ;;  %1031 = vmatprep.subr.bf16.mxu0 %v1155_v60 }
  0x67   :  { %1053 = vmatprep.subr.bf16.mxu1 %v1156_v61 }
  0x69   :  { %1032 = vmatpush3.bf16.msra.mxu0 %v1157_v62 }
  0x6a   :  { %1054 = vmatpush3.bf16.msra.mxu1 %v1158_v63  ;;  %1033 = vmatprep.subr.bf16.mxu0 %v1159_v0 }
  0x6b   :  { %1055 = vmatprep.subr.bf16.mxu1 %v1160_v1 }
  0x6d   :  { %1034 = vmatpush3.bf16.msra.mxu0 %v1161_v2 }
  0x6e   :  { %1056 = vmatpush3.bf16.msra.mxu1 %v1162_v3  ;;  %1035 = vmatprep.subr.bf16.mxu0 %v1163_v4 }
  0x6f   :  { %1057 = vmatprep.subr.bf16.mxu1 %v1164_v5  ;;  %v970_v5 = vld [vmem:[%s1379_s4] ss:$0 sm:$0xff] }
  0x71   :  { %1036 = vmatpush3.bf16.msra.mxu0 %v1165_v6 }
  0x72   :  { %1058 = vmatpush3.bf16.msra.mxu1 %v1166_v7  ;;  %1037 = vmatprep.subr.bf16.mxu0 %v1167_v8 }
  0x73   :  { %1059 = vmatprep.subr.bf16.mxu1 %v1168_v9 }
  0x75   :  { %1038 = vmatpush3.bf16.msra.mxu0 %v1169_v10 }
  0x76   :  { %1060 = vmatpush3.bf16.msra.mxu1 %v1170_v11  ;;  %1076 = vmatprep.subr.bf16.mxu0 %v1279_v25 }
  0x78   :  { %721 = vmatmul.mubr.bf16.vlgmr.msra.gmra.mrb[4].mxu0 %v83_v21 }
  0x79   :  { %762 = vmatmul.mubr.bf16.vlgmr.msra.gmra.mrb[4].mxu1 %v85_v23  ;;  %1077 = vmatpush3.bf16.msra.mxu0 %v1171_v24 }
  0x7a   :  { %1078 = vmatprep.subr.bf16.mxu0 %v1279_v25  ;;  %1092 = vmatprep.mubr.msk.bf16.mxu0 %vm1280_vm0, %v1279_v25 }
  0x7d   :  { %1079 = vmatpush3.bf16.msra.mxu0 %v1172_v26 }
  0x7e   :  { %1080 = vmatprep.subr.bf16.mxu0 %v1279_v25 }
  0x81   :  { %1081 = vmatpush3.bf16.msra.mxu0 %v1173_v27 }
  0x82   :  { %1082 = vmatprep.subr.bf16.mxu0 %v1279_v25 }
  0x85   :  { %1083 = vmatpush3.bf16.msra.mxu0 %v1174_v28 }
  0x86   :  { %1084 = vmatprep.subr.bf16.mxu0 %v1279_v25 }
  0x89   :  { %1085 = vmatpush3.bf16.msra.mxu0 %v1175_v29 }
  0x8a   :  { %1086 = vmatprep.subr.bf16.mxu0 %v1279_v25 }
  0x8d   :  { %1087 = vmatpush3.bf16.msra.mxu0 %v1176_v30 }
  0x8e   :  { %1088 = vmatprep.subr.bf16.mxu0 %v1279_v25 }
  0x91   :  { %1089 = vmatpush3.bf16.msra.mxu0 %v1177_v31 }
  0x92   :  { %1090 = vmatprep.subr.bf16.mxu0 %v1279_v25 }
  0x95   :  { %1091 = vmatpush3.bf16.msra.mxu0 %v1178_v32 }
 0x12b   :  { %v995_v33 = vpop.f32.mrb[0].mxu0 }
 0x12c   :  { %v1017_v34 = vpop.f32.mrb[0].mxu1  ;;  %v996_v36 = vpop.f32.mrb[1].mxu0 }
 0x12d   :  { %v997_v37 = vadd.f32 %v996_v36, %v995_v33  ;;  %v1018_v38 = vpop.f32.mrb[1].mxu1  ;;  %v998_v39 = vpop.f32.mrb[2].mxu0 }
 0x12e   :  { %v1019_v40 = vadd.f32 %v1018_v38, %v1017_v34  ;;  %v1020_v41 = vpop.f32.mrb[2].mxu1  ;;  %v999_v42 = vpop.f32.mrb[3].mxu0 }
 0x12f   :  { %v641_v43 = vadd.f32 %v997_v37, %v905_v35  ;;  %v1000_v44 = vadd.f32 %v999_v42, %v998_v39  ;;  %v1021_v45 = vpop.f32.mrb[3].mxu1 }
 0x130   :  { %v1022_v46 = vadd.f32 %v1021_v45, %v1020_v41 }
 0x131   :  { %v682_v47 = vadd.f32 %v1019_v40, %v641_v43  ;;  %v644_v48 = vadd.f32 %v1000_v44, %v905_v35 }
 0x133   :  { %v685_v49 = vadd.f32 %v1022_v46, %v644_v48 }
 0x14b   :  { %v1039_v50 = vpop.f32.mrb[4].mxu0 }
 0x14c   :  { %v1061_v51 = vpop.f32.mrb[4].mxu1  ;;  %v1040_v52 = vpop.f32.mrb[5].mxu0 }
 0x14d   :  { %v1041_v53 = vadd.f32 %v1040_v52, %v1039_v50  ;;  %v1062_v54 = vpop.f32.mrb[5].mxu1  ;;  %v1042_v55 = vpop.f32.mrb[6].mxu0 }
 0x14e   :  { %v1063_v56 = vadd.f32 %v1062_v54, %v1061_v51  ;;  %v1064_v57 = vpop.f32.mrb[6].mxu1  ;;  %v1043_v58 = vpop.f32.mrb[7].mxu0 }
 0x14f   :  { %v723_v59 = vadd.f32 %v1041_v53, %v682_v47  ;;  %v1044_v60 = vadd.f32 %v1043_v58, %v1042_v55  ;;  %v1065_v61 = vpop.f32.mrb[7].mxu1 }
 0x150   :  { %v1066_v62 = vadd.f32 %v1065_v61, %v1064_v57 }
 0x151   :  { %v764_v63 = vadd.f32 %v1063_v56, %v723_v59  ;;  %v726_v0 = vadd.f32 %v1044_v60, %v685_v49 }
 0x153   :  { %v767_v1 = vadd.f32 %v1066_v62, %v726_v0  ;;  %v770_v2 = vmax.f32 %v764_v63, 0.0 }
 0x155   :  { %v771_v3 = vmax.f32 %v767_v1, 0.0 }
 0x157   :  { %v772_v4 = vpack.c.bf16 %v771_v3, %v770_v2 }
 0x159   :  { %1093 = vmatmul.mubr.bf16.vlgmr.msra.gmra.mrb[8].mxu0 %v772_v4 }
 0x22c   :  { %v878_v6 = vpop.f32.mrb[8].mxu0 }
 0x22d   :  { %v879_v7 = vadd.f32 %v970_v5, %v878_v6  ;;  %v1094_v8 = vpop.f32.mrb[9].mxu0 }
 0x22e   :  { %v881_v9 = vpop.f32.mrb[10].mxu0 }
 0x22f   :  { %885 = vst [vmem:[#allocation8] sm:$0xff] %v879_v7  ;;  %v882_v10 = vadd.f32 %v970_v5, %v881_v9  ;;  %v1095_v11 = vpop.f32.mrb[11].mxu0 }
 0x231   :  { %886 = vst [vmem:[#allocation8 + $0x8] sm:$0xff] %v882_v10 }
 0x232   :  { %1256 = shalt.err (!%p1253_p0)
}
 0x233   :  { %s1257_s11 = scalar_lea.hbm %s1380_s5, 256 }
 0x234   :  { %p1258_p1 = scmp.ne.s32.totalorder %s1380_s5, %s1257_s11  ;;  %p1261_p2 = scmp.lt.u32.totalorder %s1257_s11, %s1380_s5 }
 0x236   :  { %p1263_p3 = pnand %p1261_p2, %p1258_p1 }
 0x238   :  { %1266 = shalt.err (!%p1263_p3)
}
 0x239   :  { %s1282_s16 = smov 128   ;;  %s1283_s1 = smov 8  }
 0x23a   :  { %898 = dma.vmem_to_hbm [thread:$0]  %s893_s8, 256, %s1380_s5, [#allocation4], %s1282_s16, %s1282_s16, %s1283_s1  }
 0x23b   :  { %1271 = dma.done.wait [#allocation4], 256  }
 0x23c   :  { %1272 = vsyncadd [#allocation4], 4294967040 }
 0x23d   :  { %902 = vsyncpa [#allocation3], 1 }
 0x23e   :  { %903 = vsyncpa [#allocation6], 1 }
 0x23f   :  { %904 = vsyncpa [#allocation4], 1 }

</bundles_post_ra>
